<compile_context>
chip_gen: v7x
topology: tpu7x:2x2x1
jax: 0.10.0
libtpu: 0.0.40
codegen_flags: <defaults>
</compile_context>

<pallas_src>
import functools

import jax
import jax.numpy as jnp
from jax.experimental import pallas as pl
from jax.experimental.pallas import tpu as pltpu

ELO_MIN, ELO_MAX = 500, 3000


def _round_up(x, m):
    return ((x + m - 1) // m) * m


# -----------------------------------------------------------------------------
# Kernel 1: inputs_embeds construction
#   grid = (N_pad // TM,), TM tokens per grid step.
#   Per step: issue TM row-gather DMAs from wte (HBM) into VMEM scratch, wait,
#   then do the elo/control blend vectorized over the (TM, D) block.
# -----------------------------------------------------------------------------
def _embeds_kernel(tm, ids_ref,              # SMEM prefetch: clamped gather ids [N_pad]
                   elo_ref, sel_ref,         # VMEM (tm, 1) f32 each
                   ctrl_ref,                 # VMEM (2, D) f32 (resident)
                   wte_hbm,                  # HBM (pl.ANY) [V, D] f32
                   out_ref,                  # VMEM (tm, D) f32 output block
                   gath_ref, sem):           # VMEM (tm, D) f32 scratch + DMA sem
    base = pl.program_id(0) * tm

    # Issue all tm single-row gather DMAs (kept in flight concurrently).
    @pl.loop(0, tm)
    def _issue(t):
        row = ids_ref[base + t]              # int32 scalar from SMEM
        pltpu.make_async_copy(
            wte_hbm.at[pl.ds(row, 1), :],
            gath_ref.at[pl.ds(t, 1), :],
            sem,
        ).start()

    # Wait for all tm copies (each wait matches one [1, D] row transfer).
    @pl.loop(0, tm)
    def _wait(t):
        pltpu.make_async_copy(
            wte_hbm.at[pl.ds(0, 1), :],
            gath_ref.at[pl.ds(0, 1), :],
            sem,
        ).wait()

    elo = elo_ref[...]                                        # (tm, 1)
    ctrl = ctrl_ref[...]                                      # (2, D)
    # control_embeds row = elo*ctrl[0] + (1-elo)*ctrl[1]
    ctrl_rows = elo * ctrl[0:1, :] + (1.0 - elo) * ctrl[1:2, :]   # (tm, D)
    tok_rows = gath_ref[...]                                  # (tm, D) gathered wte rows
    is_ctrl = sel_ref[...] > 0.5                              # (tm, 1) bool
    out_ref[...] = jnp.where(is_ctrl, ctrl_rows, tok_rows)    # exact select


def control_token_embeds(input_ids, wte, ctrl_w, *, block_tokens=128):
    """input_ids [B,S] int, wte [V,D] f32, ctrl_w [2,D] f32 -> inputs_embeds [B,S,D] f32."""
    assert block_tokens % 8 == 0
    B, S = input_ids.shape
    V, D = wte.shape
    N = B * S

    ids = input_ids.reshape(N).astype(jnp.int32)
    tm = min(block_tokens, _round_up(N, 8))
    n_pad = _round_up(N, tm)
    ids_p = jnp.pad(ids, (0, n_pad - N))                       # pad with token 0 (valid)

    # Cheap O(N) wrapper-side prep (fused elementwise XLA ops):
    gather_ids = jnp.clip(ids_p, 0, V - 1)                     # SMEM scalar prefetch
    is_ctrl = (ids_p >= V).astype(jnp.float32).reshape(n_pad, 1)
    elo_normed = ((jnp.clip(ids_p - V, ELO_MIN, ELO_MAX) - ELO_MIN)
                  .astype(jnp.float32) / float(ELO_MAX - ELO_MIN)).reshape(n_pad, 1)

    kernel = functools.partial(_embeds_kernel, tm)

    out = pl.pallas_call(
        kernel,
        out_shape=jax.ShapeDtypeStruct((n_pad, D), jnp.float32),
        grid_spec=pltpu.PrefetchScalarGridSpec(
            num_scalar_prefetch=1,                             # gather_ids -> SMEM
            grid=(n_pad // tm,),
            in_specs=[
                pl.BlockSpec((tm, 1), lambda i, ids: (i, 0)),  # elo_normed
                pl.BlockSpec((tm, 1), lambda i, ids: (i, 0)),  # is_ctrl
                pl.BlockSpec((2, D), lambda i, ids: (0, 0)),   # control weights (resident)
                pl.BlockSpec(memory_space=pl.ANY),             # wte stays in HBM
            ],
            out_specs=pl.BlockSpec((tm, D), lambda i, ids: (i, 0)),
            scratch_shapes=[pltpu.VMEM((tm, D), jnp.float32),
                            pltpu.SemaphoreType.DMA],
        ),
        compiler_params=pltpu.CompilerParams(
            dimension_semantics=("parallel",)),
    )(gather_ids, elo_normed, is_ctrl, ctrl_w, wte)

    return out[:N].reshape(B, S, D)


# -----------------------------------------------------------------------------
# Kernel 2: tied-weight LM head (stand-in for the wrapped model's output path)
#   grid = (N/tm, V/tn); tk = D (no reduction axis, no accumulator scratch).
#   Activation tile is resident across the vocab sweep; weight is streamed as a
#   pre-transposed [D, V] bf16 matrix (no in-kernel transpose).
# -----------------------------------------------------------------------------
def _lm_head_kernel(e_ref, wt_ref, o_ref):
    e = e_ref[...].astype(jnp.bfloat16)                        # (tm, D) cast in-kernel
    o_ref[...] = jnp.dot(e, wt_ref[...],                       # (D, tn) bf16
                         preferred_element_type=jnp.float32)


def prepare_lm_head_weight(wte):
    """One-time (hoisted out of forward): tied weight -> bf16, pre-transposed to [D, V]."""
    return wte.astype(jnp.bfloat16).T


def lm_head(embeds_f32, wte_t_bf16, *, tm=None, tn=None, vmem_limit_bytes=None):
    """embeds_f32 [N,D] f32, wte_t_bf16 [D,V] bf16 -> logits [N,V] f32."""
    N, D = embeds_f32.shape
    D2, V = wte_t_bf16.shape
    assert D == D2
    # Per-generation guidance: tm>=640 on v6e, ~512 on v7x, ~256 on v5e to be
    # MXU-bound; raise vmem_limit_bytes above the scoped default when enlarging.
    tm = tm if tm is not None else min(N, 512)
    tn = tn if tn is not None else min(V, 512)
    # TODO(synk): real vocab sizes (e.g. 50257) need padding / masked edge tiles.
    assert N % tm == 0 and V % tn == 0, (N, V, tm, tn)

    return pl.pallas_call(
        _lm_head_kernel,
        out_shape=jax.ShapeDtypeStruct((N, V), jnp.float32),
        grid_spec=pltpu.PrefetchScalarGridSpec(
            num_scalar_prefetch=0,
            grid=(N // tm, V // tn),
            in_specs=[
                # activation tile constant across j -> fetched once per i (resident)
                pl.BlockSpec((tm, D), lambda i, j: (i, 0)),
                # weight stream over the vocab axis
                pl.BlockSpec((D, tn), lambda i, j: (0, j)),
            ],
            out_specs=pl.BlockSpec((tm, tn), lambda i, j: (i, j)),
        ),
        compiler_params=pltpu.CompilerParams(
            dimension_semantics=("parallel", "parallel"),
            vmem_limit_bytes=vmem_limit_bytes),
    )(embeds_f32, wte_t_bf16)


def forward(input_ids, wte, ctrl_w, wte_t_bf16=None, *, block_tokens=128, lm_tiles=None):
    B, S = input_ids.shape
    V, D = wte.shape
    if wte_t_bf16 is None:
        # Callers should pass the cached result of prepare_lm_head_weight(wte).
        wte_t_bf16 = prepare_lm_head_weight(wte)
    inputs_embeds = control_token_embeds(input_ids, wte, ctrl_w,
                                         block_tokens=block_tokens)     # [B,S,D] f32
    logits = lm_head(inputs_embeds.reshape(B * S, D), wte_t_bf16,
                     **(lm_tiles or {}))
    # mimics `output_hidden_states=True`: return logits + the hidden states we own
    return {"logits": logits.reshape(B, S, V), "inputs_embeds": inputs_embeds}


# -----------------------------------------------------------------------------
# Pure-JAX reference (mirrors the PyTorch forward semantics exactly)
# -----------------------------------------------------------------------------
def reference_embeds(input_ids, wte, ctrl_w):
    V, D = wte.shape
    elo_mask = (input_ids >= V)[..., None]                                    # [B,S,1]
    elo_normed = (jnp.clip(input_ids - V, ELO_MIN, ELO_MAX) - ELO_MIN
                  ).astype(jnp.float32) / float(ELO_MAX - ELO_MIN)            # [B,S]
    control_values = jnp.stack((elo_normed, 1.0 - elo_normed), axis=2)        # [B,S,2]
    control_embeds = control_values @ ctrl_w                                  # [B,S,D]
    token_embeds = wte[jnp.clip(input_ids, 0, V - 1)]                         # [B,S,D]
    return jnp.where(elo_mask, control_embeds, token_embeds)


if __name__ == "__main__":
    # small, lane-aligned shapes consistent with the module
    B, S = 2, 8
    VOCAB, D = 256, 256

    key = jax.random.PRNGKey(0)
    k_wte, k_ctrl, k_ids, k_elo = jax.random.split(key, 4)

    # deterministic parameter init (normal, std=0.02, as in the module / GPT-2 wte)
    wte = (0.02 * jax.random.normal(k_wte, (VOCAB, D))).astype(jnp.float32)
    ctrl_w = (0.02 * jax.random.normal(k_ctrl, (2, D))).astype(jnp.float32)

    # input_ids: mix of normal tokens and elo control tokens (id = VOCAB + elo)
    input_ids = jax.random.randint(k_ids, (B, S), 0, VOCAB, dtype=jnp.int32)
    elos = jax.random.randint(k_elo, (B,), 400, 3200, dtype=jnp.int32)
    input_ids = input_ids.at[:, 0].set(VOCAB + elos)   # position 0 carries control token

    # one-time weight prep (hoisted out of forward, per review)
    wte_t_bf16 = prepare_lm_head_weight(wte)

    # small tiles so the multi-step grid / gather loop / residency paths are exercised
    out = forward(input_ids, wte, ctrl_w, wte_t_bf16,
                  block_tokens=8, lm_tiles=dict(tm=8, tn=128))
    jax.block_until_ready(out)

    # correctness: inputs_embeds against exact PyTorch-semantics f32 reference
    ref_e = reference_embeds(input_ids, wte, ctrl_w)
    assert jnp.allclose(out["inputs_embeds"], ref_e, atol=1e-6, rtol=1e-5), (
        "embeds mismatch, max abs err "
        + str(float(jnp.max(jnp.abs(out["inputs_embeds"] - ref_e)))))

    # correctness: logits against a reference using the same bf16 operand rounding
    e_b = ref_e.astype(jnp.bfloat16).astype(jnp.float32)
    w_b = wte.astype(jnp.bfloat16).astype(jnp.float32)
    ref_logits = jnp.einsum("bsd,vd->bsv", e_b, w_b)
    assert jnp.allclose(out["logits"], ref_logits, atol=1e-4, rtol=1e-3), (
        "logits mismatch, max abs err "
        + str(float(jnp.max(jnp.abs(out["logits"] - ref_logits)))))

    print("KERNEL_OK")
</pallas_src>

<mosaic_0001>
module attributes {stable_mosaic.version = 11 : i64} {
  func.func @_embeds_kernel(%arg0: i32, %arg1: memref<16xi32, #tpu.memory_space<smem>>, %arg2: memref<8x1xf32, #tpu.memory_space<vmem>>, %arg3: memref<8x1xf32, #tpu.memory_space<vmem>>, %arg4: memref<2x256xf32, #tpu.memory_space<vmem>>, %arg5: memref<256x256xf32, #tpu.memory_space<any>>, %arg6: memref<8x256xf32, #tpu.memory_space<vmem>>, %arg7: memref<8x256xf32, #tpu.memory_space<vmem>>, %arg8: memref<!tpu.dma_semaphore, #tpu.memory_space<semaphore_mem>>) attributes {dimension_semantics = [#tpu.dimension_semantics<parallel>], iteration_bounds = array<i64: 2>, scalar_prefetch = 1 : i64, scratch_operands = 2 : i64, tpu.core_type = #tpu.core_type<tc>, window_params = [{transform_indices = @transform_0, window_bounds = array<i64: 8, 1>}, {transform_indices = @transform_1, window_bounds = array<i64: 8, 1>}, {pipeline_mode = #tpu.pipeline_mode<synchronous>, transform_indices = @transform_2, window_bounds = array<i64: 2, 256>}, {}, {transform_indices = @transform_4, window_bounds = array<i64: 8, 256>}]} {
    %c8_i32 = arith.constant 8 : i32
    %0 = arith.muli %arg0, %c8_i32 : i32
    %c0_i32 = arith.constant 0 : i32
    %c8_i32_0 = arith.constant 8 : i32
    %1 = arith.addi %c0_i32, %c8_i32_0 : i32
    %c1_i32 = arith.constant 1 : i32
    scf.for %arg9 = %c0_i32 to %1 step %c1_i32  : i32 {
      %c1_i32_15 = arith.constant 1 : i32
      %24 = arith.muli %arg9, %c1_i32_15 : i32
      %c0_i32_16 = arith.constant 0 : i32
      %25 = arith.addi %c0_i32_16, %24 : i32
      %26 = arith.addi %0, %25 : i32
      %27 = arith.index_cast %26 : i32 to index
      %28 = memref.load %arg1[%27] : memref<16xi32, #tpu.memory_space<smem>>
      %c0_i32_17 = arith.constant 0 : i32
      %29 = tpu.memref_slice %arg5[%28, %c0_i32_17] : memref<256x256xf32, #tpu.memory_space<any>> -> memref<1x256xf32, #tpu.memory_space<any>>
      %c0_i32_18 = arith.constant 0 : i32
      %30 = tpu.memref_slice %arg7[%25, %c0_i32_18] : memref<8x256xf32, #tpu.memory_space<vmem>> -> memref<1x256xf32, #tpu.memory_space<vmem>>
      tpu.enqueue_dma source(%29 : memref<1x256xf32, #tpu.memory_space<any>>) target(%30 : memref<1x256xf32, #tpu.memory_space<vmem>>) target_semaphore(%arg8 : memref<!tpu.dma_semaphore, #tpu.memory_space<semaphore_mem>>)
    }
    %c8_i32_1 = arith.constant 8 : i32
    %c0_i32_2 = arith.constant 0 : i32
    %c8_i32_3 = arith.constant 8 : i32
    %2 = arith.addi %c0_i32_2, %c8_i32_3 : i32
    %c1_i32_4 = arith.constant 1 : i32
    scf.for %arg9 = %c0_i32_2 to %2 step %c1_i32_4  : i32 {
      %c0_i32_15 = arith.constant 0 : i32
      %c0_i32_16 = arith.constant 0 : i32
      %24 = tpu.memref_slice %arg5[%c0_i32_15, %c0_i32_16] : memref<256x256xf32, #tpu.memory_space<any>> -> memref<1x256xf32, #tpu.memory_space<any>>
      %c0_i32_17 = arith.constant 0 : i32
      %c0_i32_18 = arith.constant 0 : i32
      %25 = tpu.memref_slice %arg7[%c0_i32_17, %c0_i32_18] : memref<8x256xf32, #tpu.memory_space<vmem>> -> memref<1x256xf32, #tpu.memory_space<vmem>>
      tpu.wait_dma2 semaphore(%arg8 : memref<!tpu.dma_semaphore, #tpu.memory_space<semaphore_mem>>) src(%24 : memref<1x256xf32, #tpu.memory_space<any>>) dst(%25 : memref<1x256xf32, #tpu.memory_space<vmem>>)
    }
    %c0 = arith.constant 0 : index
    %c0_5 = arith.constant 0 : index
    %3 = vector.load %arg2[%c0, %c0_5] : memref<8x1xf32, #tpu.memory_space<vmem>>, vector<8x1xf32>
    %c0_6 = arith.constant 0 : index
    %c0_7 = arith.constant 0 : index
    %4 = vector.load %arg4[%c0_6, %c0_7] : memref<2x256xf32, #tpu.memory_space<vmem>>, vector<2x256xf32>
    %5 = vector.extract_strided_slice %4 {offsets = [0, 0], sizes = [1, 256], strides = [1, 1]} : vector<2x256xf32> to vector<1x256xf32>
    %6 = vector.broadcast %3 : vector<8x1xf32> to vector<8x256xf32>
    %7 = vector.broadcast %5 : vector<1x256xf32> to vector<8x256xf32>
    %8 = arith.mulf %6, %7 : vector<8x256xf32>
    %cst = arith.constant 1.000000e+00 : f32
    %9 = vector.broadcast %cst : f32 to vector<8x1xf32>
    %10 = arith.subf %9, %3 : vector<8x1xf32>
    %11 = vector.extract_strided_slice %4 {offsets = [1, 0], sizes = [1, 256], strides = [1, 1]} : vector<2x256xf32> to vector<1x256xf32>
    %12 = vector.broadcast %10 : vector<8x1xf32> to vector<8x256xf32>
    %13 = vector.broadcast %11 : vector<1x256xf32> to vector<8x256xf32>
    %14 = arith.mulf %12, %13 : vector<8x256xf32>
    %15 = arith.addf %8, %14 : vector<8x256xf32>
    %c0_8 = arith.constant 0 : index
    %c0_9 = arith.constant 0 : index
    %16 = vector.load %arg7[%c0_8, %c0_9] : memref<8x256xf32, #tpu.memory_space<vmem>>, vector<8x256xf32>
    %c0_10 = arith.constant 0 : index
    %c0_11 = arith.constant 0 : index
    %17 = vector.load %arg3[%c0_10, %c0_11] : memref<8x1xf32, #tpu.memory_space<vmem>>, vector<8x1xf32>
    %cst_12 = arith.constant 5.000000e-01 : f32
    %18 = vector.broadcast %cst_12 : f32 to vector<8x1xf32>
    %19 = arith.cmpf ogt, %17, %18 : vector<8x1xf32>
    %20 = vector.shape_cast %19 : vector<8x1xi1> to vector<8x1xi1>
    %21 = vector.broadcast %20 : vector<8x1xi1> to vector<8x256xi1>
    %22 = arith.select %21, %15, %16 : vector<8x256xi1>, vector<8x256xf32>
    %c0_13 = arith.constant 0 : index
    %c0_14 = arith.constant 0 : index
    %23 = vector.load %arg6[%c0_13, %c0_14] : memref<8x256xf32, #tpu.memory_space<vmem>>, vector<8x256xf32>
    tpu.vector_store %arg6[%c0_13, %c0_14], %22 {strides = array<i32>} : memref<8x256xf32, #tpu.memory_space<vmem>>, vector<8x256xf32>,
    return
  }
  func.func @transform_0(%arg0: i32, %arg1: memref<16xi32, #tpu.memory_space<smem>>) -> (i32, i32) {
    %c0_i32 = arith.constant 0 : i32
    %c0_i32_0 = arith.constant 0 : i32
    return %arg0, %c0_i32 : i32, i32
  }
  func.func @transform_1(%arg0: i32, %arg1: memref<16xi32, #tpu.memory_space<smem>>) -> (i32, i32) {
    %c0_i32 = arith.constant 0 : i32
    %c0_i32_0 = arith.constant 0 : i32
    return %arg0, %c0_i32 : i32, i32
  }
  func.func @transform_2(%arg0: i32, %arg1: memref<16xi32, #tpu.memory_space<smem>>) -> (i32, i32) {
    %c0_i32 = arith.constant 0 : i32
    %c0_i32_0 = arith.constant 0 : i32
    %c0_i32_1 = arith.constant 0 : i32
    return %c0_i32, %c0_i32_0 : i32, i32
  }
  func.func @transform_4(%arg0: i32, %arg1: memref<16xi32, #tpu.memory_space<smem>>) -> (i32, i32) {
    %c0_i32 = arith.constant 0 : i32
    %c0_i32_0 = arith.constant 0 : i32
    return %arg0, %c0_i32 : i32, i32
  }
}

</mosaic_0001>

<bundles_post_ra>
// kernel: tpu_custom_call.1
= control target key start
LH: loop header
LB: loop body
LE: loop exit
PB: predicated region body
PF: predicated region fallthrough
CT: control target
= control target key end

     0   :  { %s791_s0 = inlined_call_operand.vmem [shape: s32[16], index: 0, kind: input, shape index: {}]   ;;  %s792_s1 = inlined_call_operand.vmem [shape: f32[16,1], index: 1, kind: input, shape index: {}]   ;;  %s793_s2 = inlined_call_operand.vmem [shape: f32[16,1], index: 2, kind: input, shape index: {}]   ;;  %s794_s3 = inlined_call_operand.vmem [shape: f32[2,256], index: 3, kind: input, shape index: {}]   ;;  %s795_s4 = inlined_call_operand.hbm [shape: f32[256,256], index: 4, kind: input, shape index: {}]   ;;  %s796_s5 = inlined_call_operand.hbm [shape: f32[16,256], index: 5, kind: output, shape index: {}]  }
   0x1   :  { %801 = sst [smem:[#allocation15_spill]] %s792_s1  ;;  %s10_s20 = sshll.u32 %s791_s0, 4  ;;  %s11_s20 = int_to_ptr.vmem [resolvable:$true] %s10_s20 }
   0x2   :  { %802 = sst [smem:[#allocation16_spill]] %s793_s2  ;;  %s482_s21 = scalar_lea.vmem %s11_s20, 16 }
   0x3   :  { %p483_p0 = scmp.ne.s32.totalorder %s11_s20, %s482_s21  ;;  %p487_p1 = scmp.lt.s32.totalorder %s11_s20, %s11_s20 }
   0x4   :  { %p488_p2 = scmp.lt.s32.totalorder %s482_s21, %s482_s21 }
   0x6   :  { %p489_p3 = por %p488_p2, %p487_p1 }
   0x8   :  { %p490_p4 = pnand %p489_p3, %p483_p0 }
   0xa   :  { %493 = shalt.err (!%p490_p4)  }
   0xb   :  { %s602_s22 = smov [#allocation5]  }
   0xc   :  { %13 = dma.vmem_to_smem %s11_s20, 16, %s602_s22, [#allocation4] }
   0xd   :  { %570 = dma.done.wait [#allocation4], 16 }
   0xe   :  { %571 = vsyncadd [#allocation4], 4294967280 }
   0xf   :  { %15 = sfence }
  0x10   :  { %16 = vsyncpa [#allocation7], 0 }
  0x11   :  { %18 = vsyncpa [#allocation7 + $0x1], 0  ;;  %s641_s23 = smov 0   ;;  %s643_s24 = smov 0  }
  0x12   :  { %s645_s0 = smov 0   ;;  %s647_s25 = smov 0  }
  0x13 LB: > { %803 = sst [smem:[#allocation12_spill]] %s588_s0  ;;  %s662_s26 = sadd.s32 4294967295, %s592_s25   ;;  %s592_s25 = sphi %s647_s25, %s812_s25   ;;  %s588_s0 = sphi %s645_s0, %s814_s0   ;;  %s584_s24 = sphi %s643_s24, %s816_s24   ;;  %s580_s23 = sphi %s641_s23, %s815_s23  }
  0x14   : > { %s403_s27 = sadd.s32 4294967294, %s592_s25   ;;  %s666_s28 = sadd.s32 1, %s592_s25  }
  0x15   : > { %804 = sst [smem:[#allocation13_spill]] %s666_s28  ;;  %s104_s29 = sadd.s32 1, %s588_s0 }
  0x16   : > { %s101_s30 = ssub.s32 %s592_s25, %s666_s28  ;;  %p114_p5 = scmp.ne.s32.totalorder %s588_s0, %s584_s24 }
  0x17   : > { %p102_p6 = scmp.eq.s32.totalorder %s101_s30, 0  ;;  %p115_p7 = scmp.eq.s32.totalorder %s662_s26, 1 }
  0x18   : > { %p120_p8 = scmp.ne.s32.totalorder %s584_s24, %s580_s23  ;;  %p121_p9 = scmp.eq.s32.totalorder %s403_s27, 1 }
  0x19   : > { %s677_s6 = scalar_select %p102_p6, %s588_s0, %s104_s29  }
  0x1a   : > { %p679_p10 = por %p115_p7, %p114_p5  ;;  %p683_p11 = por %p121_p9, %p120_p8 }
  0x1b   : > { %805 = sst [smem:[#allocation14_spill]] %s677_s6  ;;  %p406_p12 = scmp.ge.s32.totalorder %s592_s25, 1 }
  0x1c   : > { %p156_p13 = scmp.lt.s32.totalorder %s592_s25, 3 }
  0x1e   : > { %p157_p0 = pnand %p406_p12, %p156_p13 }
  0x1f   : > { %s797_s9 = sand.u32 (!%p157_p0), 1, %s584_s24   ;;  %p183_p1 = scmp.lt.s32.totalorder (!%p157_p0), %s662_s26, 1 }
  0x20   : > { %160 = sbr.rel (%p157_p0) target bundleno = 244 (0xf4), region = 32  ;;  %s407_s10 = sshll.u32 (!%p157_p0), %s797_s9, 4 }
  0x21   : > { %s808_s1 = sld [smem:[#allocation15_spill]] (!%p157_p0)  ;;  %s809_s2 = sld [smem:[#allocation16_spill]] (!%p157_p0) }
  0x22   : > { %s705_s20 = scalar_lea.vmem (!%p157_p0), [#allocation6], %s407_s10  ;;  %s707_s21 = smov (!%p157_p0), 0  }
  0x27   : > { %s184_s12 = scalar_select %p183_p1, %s662_s26, 1 }
  0x29   : > { %s408_s13 = sshll.u32 %s184_s12, 3 }
  0x2a   : > { %s698_s16 = scalar_lea.vmem %s808_s1, %s408_s13  ;;  %s703_s19 = scalar_lea.vmem %s809_s2, %s408_s13 }
  0x2b LB: >> { %s810_s11 = sshll.u32 %s662_s26, 3  ;;  %s206_s27 = sshrl.u32 %s596_s21, 3  ;;  %s596_s21 = sphi %s707_s21, %s197_s21  }
  0x2c   : >> { %s198_s22 = sadd.s32 %s596_s21, %s810_s11  ;;  %s207_s30 = sand.u32 7, %s596_s21  }
  0x2d   : >> { %s199_s29 = sld [smem:[#allocation5 + %s198_s22]]  ;;  %s413_s12 = sshll.u32 %s206_s27, 4 }
  0x2e   : >> { %s209_s13 = sadd.s32 %s413_s12, %s207_s30  ;;  %s496_s27 = scalar_lea.hbm %s795_s4, 8192 }
  0x2f   : >> { %s210_s10 = scalar_lea.vmem [#allocation2], %s209_s13 }
  0x30   : >> { %s212_s14 = sshll.u32 %s210_s10, 4  ;;  %s717_s14 = int_to_ptr.vmem [resolvable:$true] %s212_s14 }
  0x33   : >> { %s200_s15 = sshrl.u32 %s199_s29, 3  ;;  %s201_s17 = sand.u32 7, %s199_s29  }
  0x34   : >> { %s411_s18 = sshll.u32 %s200_s15, 4 }
  0x35   : >> { %s203_s9 = sadd.s32 %s411_s18, %s201_s17 }
  0x36   : >> { %s412_s1 = sshll.u32 %s203_s9, 4 }
  0x37   : >> { %s205_s0 = scalar_lea.hbm %s795_s4, %s412_s1 }
  0x38   : >> { %s494_s28 = scalar_lea.hbm %s205_s0, 32  ;;  %p497_p3 = scmp.lt.u32.totalorder %s205_s0, %s795_s4 }
  0x39   : >> { %p495_p2 = scmp.ne.s32.totalorder %s205_s0, %s494_s28  ;;  %p498_p4 = scmp.lt.u32.totalorder %s496_s27, %s494_s28 }
  0x3a   : >> { %p500_p6 = scmp.lt.u32.totalorder %s494_s28, %s205_s0 }
  0x3b   : >> { %p499_p5 = por %p498_p4, %p497_p3 }
  0x3d   : >> { %p501_p7 = por %p500_p6, %p499_p5 }
  0x3f   : >> { %p502_p8 = pnand %p501_p7, %p495_p2 }
  0x41   : >> { %505 = shalt.err (!%p502_p8)  }
  0x42   : >> { %s506_s1 = scalar_lea.vmem %s717_s14, 32  ;;  %s603_s2 = smov [#allocation2]  }
  0x43   : >> { %p507_p9 = scmp.ne.s32.totalorder %s717_s14, %s506_s1  ;;  %s508_s6 = sshll.u32 %s603_s2, 4  ;;  %s509_s6 = int_to_ptr.vmem [resolvable:$false] %s508_s6 }
  0x44   : >> { %s510_s9 = scalar_lea.vmem %s509_s6, 256  ;;  %p511_p12 = scmp.lt.s32.totalorder %s717_s14, %s509_s6 }
  0x45   : >> { %p512_p13 = scmp.lt.s32.totalorder %s510_s9, %s506_s1 }
  0x47   : >> { %p513_p0 = por %p512_p13, %p511_p12 }
  0x49   : >> { %p514_p1 = pnand %p513_p0, %p507_p9 }
  0x4b   : >> { %517 = shalt.err (!%p514_p1)  }
  0x4c   : >> { %s604_s11 = smov 128   ;;  %s605_s28 = smov 1  }
  0x4d   : >> { %215 = dma.hbm_to_vmem [thread:$0]  %s205_s0, 32, %s717_s14, [#allocation3], %s604_s11, %s604_s11, %s605_s28 }
  0x4e   : >> { %s197_s21 = sadd.s32 1, %s596_s21  }
  0x4f   : >> { %p194_p2 = scmp.ge.s32.totalorder %s197_s21, 8  }
  0x50   : > { %s598_s29 = smov (%p194_p2), 0  }
  0x51   : > { %196 = sbr.rel (!%p194_p2) target bundleno = 43 (0x2b), region = 86 }
  0x58 LB: >> { %572 = dma.done.wait [#allocation3], 32  ;;  %s600_s29 = sphi %s598_s29, %s221_s29  }
  0x59   : >> { %573 = vsyncadd [#allocation3], 4294967264  ;;  %s221_s29 = sadd.s32 1, %s600_s29  }
  0x5a   : >> { %p218_p3 = scmp.ge.s32.totalorder %s221_s29, 8  }
  0x5b   : > { %v225_v0 = vld [vmem:[%s698_s16] sm:$0xff] (%p218_p3)  ;;  %v606_v2 = vmov (%p218_p3), 0   ;;  %v233_v5 = vlaneseq (%p218_p3)  ;;  %s420_s16 = sshll.u32 (%p218_p3), %s662_s26, 8  ;;  %v282_v28 = vld [vmem:[#allocation2 + $0x8] sm:$0xff] (%p218_p3)  ;;  %s811_s26 = sand.u32 (%p218_p3), 1, %s584_s24  }
  0x5c   : > { %220 = sbr.rel (!%p218_p3) target bundleno = 88 (0x58), region = 97  ;;  %v283_v1 = vld [vmem:[%s703_s19] sm:$0xff] (%p218_p3)  ;;  %480 = vset.pattern.permute.xlu0 (%p218_p3), %v606_v2  ;;  %481 = vset.pattern.permute.xlu1 (%p218_p3), %v606_v2  ;;  %v253_v3 = vsub.f32 (%p218_p3), 1.0, %v225_v0  ;;  %s309_s19 = sshll.u32 (%p218_p3), %s705_s20, 4  ;;  %s747_s19 = int_to_ptr.vmem [resolvable:$true] %s309_s19 }
  0x5d   : > { %vm284_vm0 = vcmp.gt.f32.partialorder (%p218_p3), %v283_v1, 0.5  ;;  %229 = vperm.xlu0 (%p218_p3), %480, %v225_v0   ;;  %v234_v6 = vshrl.u32 (%p218_p3), %v233_v5, 7  ;;  %v226_v11 = vld [vmem:[%s794_s3] sm:$0xf] (%p218_p3)  ;;  %s745_s14 = scalar_lea.hbm (%p218_p3), %s796_s5, %s420_s16  ;;  %s295_s15 = scalar_lea.sflag (%p218_p3), [#allocation7], %s811_s26 }
  0x5e   : > { %v285_v4 = vsel (%p218_p3), %vm284_vm0, 1, %v606_v2  ;;  %v281_v27 = vld [vmem:[#allocation2] sm:$0xff] (%p218_p3)  ;;  %s518_s17 = scalar_lea.vmem (%p218_p3), %s747_s19, 256  ;;  %s607_s18 = smov (%p218_p3), [#allocation6]  }
  0x5f   : > { %287 = vperm.xlu1 (%p218_p3), %481, %v285_v4   ;;  %v235_v7 = vsub.s32 (%p218_p3), 0, %v234_v6  ;;  %v239_v8 = vsub.s32 (%p218_p3), 2, %v234_v6  ;;  %v261_v9 = vsub.s32 (%p218_p3), 1, %v234_v6  ;;  %v265_v10 = vsub.s32 (%p218_p3), 3, %v234_v6  ;;  %p519_p4 = scmp.ne.s32.totalorder (%p218_p3), %s747_s19, %s518_s17  ;;  %s522_s22 = sshll.u32 (%p218_p3), %s607_s18, 4  ;;  %s523_s22 = int_to_ptr.vmem [resolvable:$false] %s522_s22 }
  0x60   : > { %s524_s27 = scalar_lea.vmem (%p218_p3), %s523_s22, 512  ;;  %p525_p7 = scmp.lt.s32.totalorder (%p218_p3), %s747_s19, %s523_s22 }
  0x61   : > { %256 = vperm.xlu0 (%p218_p3), %480, %v253_v3   ;;  %v236_v12 = vrot.slane (%p218_p3), %v226_v11, %v235_v7  ;;  %v240_v13 = vrot.slane (%p218_p3), %v226_v11, %v239_v8  ;;  %v262_v14 = vrot.slane (%p218_p3), %v226_v11, %v261_v9  ;;  %v266_v15 = vrot.slane (%p218_p3), %v226_v11, %v265_v10  ;;  %p520_p5 = pnand (%p218_p3), %p519_p4, %p679_p10  ;;  %p526_p8 = scmp.lt.s32.totalorder (%p218_p3), %s524_s27, %s518_s17 }
  0x63   : > { %v246_v17 = vrot.slane %v236_v12, %v235_v7  ;;  %v250_v18 = vrot.slane %v240_v13, %v235_v7  ;;  %v272_v19 = vrot.slane %v262_v14, %v261_v9  ;;  %v276_v20 = vrot.slane %v266_v15, %v261_v9  ;;  %p521_p6 = pneg %p520_p5  ;;  %p527_p9 = por %p526_p8, %p525_p7 }
  0x65   : > { %p528_p12 = pnand %p527_p9, %p521_p6 }
  0xdc   : > { %v230_v16 = vpop.permute.xlu0 %229 }
  0xdd   : > { %v251_v23 = vmul.f32 %v246_v17, %v230_v16  ;;  %v252_v24 = vmul.f32 %v250_v18, %v230_v16 }
  0xde   : > { %v288_v21 = vpop.permute.xlu1 %287 }
  0xdf   : > { %vm289_vm1 = vcmp.eq.s32.totalorder %v288_v21, 1 }
  0xe0   : > { %v257_v22 = vpop.permute.xlu0 %256 }
  0xe1   : > { %v277_v25 = vmul.f32 %v272_v19, %v257_v22  ;;  %v278_v26 = vmul.f32 %v276_v20, %v257_v22 }
  0xe3   : > { %v279_v29 = vadd.f32 %v277_v25, %v251_v23  ;;  %v280_v30 = vadd.f32 %v278_v26, %v252_v24 }
  0xe5   : > { %v290_v31 = vsel %vm289_vm1, %v279_v29, %v281_v27  ;;  %v291_v32 = vsel %vm289_vm1, %v280_v30, %v282_v28 }
  0xe6   : > { %292 = vst [vmem:[%s705_s20] sm:$0xff] %v290_v31  ;;  %293 = vst [vmem:[%s705_s20 + $0x8] sm:$0xff] %v291_v32 }
  0xe7   : > { %531 = shalt.err (!%p528_p12)
}
  0xe8   : > { %s532_s20 = scalar_lea.hbm %s745_s14, 256  ;;  %s536_s1 = scalar_lea.hbm %s796_s5, 512 }
  0xe9   : > { %p533_p13 = scmp.ne.s32.totalorder %s745_s14, %s532_s20  ;;  %p537_p2 = scmp.lt.u32.totalorder %s745_s14, %s796_s5 }
  0xea   : > { %p538_p3 = scmp.lt.u32.totalorder %s536_s1, %s532_s20  ;;  %p540_p5 = scmp.lt.u32.totalorder %s532_s20, %s745_s14 }
  0xeb   : > { %p534_p0 = pnand %p533_p13, %p679_p10 }
  0xec   : > { %p539_p4 = por %p538_p3, %p537_p2 }
  0xed   : > { %p535_p1 = pneg %p534_p0 }
  0xee   : > { %p541_p6 = por %p540_p5, %p539_p4 }
  0xf0   : > { %p542_p7 = pnand %p541_p6, %p535_p1 }
  0xf2   : > { %545 = shalt.err (!%p542_p7)
}
  0xf3   : > { %421 = dma.vmem_to_hbm [thread:$0]  (%p679_p10), %s747_s19, 256, %s745_s14, %s295_s15  }
  0xf4 PF: > { %p427_p8 = scmp.ge.s32.totalorder %s592_s25, 2  ;;  %s321_s9 = sand.u32 1, %s580_s23  }
  0xf5   : > { %s322_s11 = scalar_lea.sflag [#allocation7], %s321_s9 }
  0xf6   : > { %p424_p9 = pnand %p427_p8, %p683_p11 }
  0xf8   : > { %575 = dma.done.wait (!%p424_p9), %s322_s11, 256  }
  0xf9   : > { %577 = vsyncadd (!%p424_p9), %s322_s11, 4294967040  ;;  %s812_s25 = sld [smem:[#allocation13_spill]]  ;;  %s813_s28 = sld [smem:[#allocation12_spill]] }
  0xfa   : > { %s814_s0 = sld [smem:[#allocation14_spill]]  ;;  %s815_s23 = smov %s584_s24 }
  0xff   : > { %p21_p12 = scmp.ge.s32.totalorder %s812_s25, 4   ;;  %s816_s24 = smov %s813_s28 }
 0x101   :  { %23 = sbr.rel (!%p21_p12) target bundleno = 19 (0x13), region = 108 }
 0x108   :  { %327 = vsyncpa [#allocation7], 1 }
 0x109   :  { %329 = vsyncpa [#allocation7 + $0x1], 1 }
 0x10a   :  { %330 = vsyncmov [#allocation3] }
 0x10d   :  { %s331_s7 = vpop.sfrf %330 }
 0x10e   :  { %p419_p10 = scmp.ne.s32.totalorder %s331_s7, 0 }
 0x110   :  { %335 = shalt.err (%p419_p10)  }

</bundles_post_ra>
